<compile_context>
chip_gen: v6e
topology: v6e:2x2x1
jax: 0.10.0
libtpu: 0.0.40
codegen_flags: <defaults>
</compile_context>

<pallas_src>
import functools

import jax
import jax.numpy as jnp
from jax import lax
from jax.experimental import pallas as pl
from jax.experimental.pallas import tpu as pltpu


def _round_up(x, m):
    return (x + m - 1) // m * m


def _choose_tile(dim, max_tile, align):
    """Pick (tile, padded_dim): tile is a multiple of `align` and divides padded_dim."""
    dim_aligned = _round_up(dim, align)
    if dim_aligned <= max_tile:
        return dim_aligned, dim_aligned
    for t in range(max_tile - max_tile % align, align - 1, -align):
        if dim_aligned % t == 0:
            return t, dim_aligned
    return align, dim_aligned


# ----------------------------------------------------------------------------
# Kernel 1: per-block rank-1 weight transform
#   filt[r] = W[r] - (2 / (R_r R_r^T)) * (W[r] R_r^T) R_r
# ----------------------------------------------------------------------------
def _ether_transform_kernel(r_ref, w_ref, o_ref):
    # r_ref: (1, m)    row vector R_r for this diagonal block
    # w_ref: (tf, m)   f-tile of the weight slab for this block
    # o_ref: (tf, m)
    R = r_ref[...].astype(jnp.float32)                    # (1, m)
    W = w_ref[...].astype(jnp.float32)                    # (tf, m)
    den = jnp.sum(R * R)                                  # scalar   R R^T
    v = jnp.sum(W * R, axis=-1, keepdims=True)            # (tf, 1)  W R^T (VPU mul + lane reduce)
    # TODO(synk): no epsilon guard on `den` — matches the PyTorch module, which divides directly.
    o_ref[...] = (W - (2.0 / den) * v * R).astype(o_ref.dtype)


def ether_transform_weight(weight, ether_R, nb, *, max_tf=512, vmem_tile_budget=4 << 20):
    """weight: [f, d]; ether_R: [nb, d//nb] -> transformed weight [f, d].

    Uses the same row-major reshape (nb, f, d//nb) as the PyTorch module.
    """
    f, d = weight.shape
    m = d // nb
    assert nb * m == d, "nb must divide in_features"
    w3 = weight.reshape(nb, f, m)          # identical layout to torch's reshape
    r3 = ether_R.reshape(nb, 1, m)

    itemsize = jnp.dtype(weight.dtype).itemsize
    sub = max(8, 32 // itemsize)
    # Cap the f-tile so one (tf, m) tile stays within a modest VMEM budget
    # (tiles are double-buffered for input and output).
    tf_cap = max(sub, (vmem_tile_budget // max(1, m * itemsize)) // sub * sub)
    tf, f_pad = _choose_tile(f, min(max_tf, tf_cap), sub)
    if f_pad != f:
        w3 = jnp.pad(w3, ((0, 0), (0, f_pad - f), (0, 0)))

    out = pl.pallas_call(
        _ether_transform_kernel,
        out_shape=jax.ShapeDtypeStruct((nb, f_pad, m), weight.dtype),
        grid=(nb, f_pad // tf),
        in_specs=[
            pl.BlockSpec((None, 1, m), lambda r, i: (r, 0, 0)),
            pl.BlockSpec((None, tf, m), lambda r, i: (r, i, 0)),
        ],
        out_specs=pl.BlockSpec((None, tf, m), lambda r, i: (r, i, 0)),
        compiler_params=pltpu.CompilerParams(
            dimension_semantics=("parallel", "parallel")),
    )(r3, w3)
    if f_pad != f:
        out = out[:, :f, :]
    return out.reshape(f, d)


# ----------------------------------------------------------------------------
# Kernel 2: tiled linear  y = x @ filt.T + bias
# ----------------------------------------------------------------------------
def _linear_kernel(x_ref, w_ref, b_ref, o_ref, acc_ref):
    # x_ref: (tm, tk); w_ref: (tn, tk); b_ref: (1, tn); o_ref: (tm, tn); acc_ref: (tm, tn) f32
    k = pl.program_id(2)

    @pl.when(k == 0)
    def _():
        acc_ref[...] = jnp.zeros_like(acc_ref)

    # Contract the last dims of both operands -> MXU-native, no in-kernel transpose,
    # no operand upcast (accumulation forced to f32 via preferred_element_type).
    acc_ref[...] += lax.dot_general(
        x_ref[...], w_ref[...],
        dimension_numbers=(((1,), (1,)), ((), ())),
        preferred_element_type=jnp.float32)

    @pl.when(k == pl.num_programs(2) - 1)
    def _():
        o_ref[...] = (acc_ref[...] + b_ref[...].astype(jnp.float32)).astype(o_ref.dtype)


def pallas_linear(x_flat, filt, bias, *, max_tm=256, max_tn=256, max_tk=512):
    """y = x_flat @ filt.T + bias with (M, N, K) tiling and an f32 VMEM accumulator."""
    M, d = x_flat.shape
    f, d2 = filt.shape
    assert d == d2
    out_dtype = x_flat.dtype
    filt = filt.astype(out_dtype)

    sub = max(8, 32 // jnp.dtype(out_dtype).itemsize)
    tm, Mp = _choose_tile(M, max_tm, sub)
    tn, Np = _choose_tile(f, max_tn, 128)   # lane-dense output tile (multiple of 128)
    tk, Kp = _choose_tile(d, max_tk, 128)

    if Mp != M or Kp != d:
        x_flat = jnp.pad(x_flat, ((0, Mp - M), (0, Kp - d)))
    if Np != f or Kp != d:
        filt = jnp.pad(filt, ((0, Np - f), (0, Kp - d)))
    b2 = bias.reshape(1, f)
    if Np != f:
        b2 = jnp.pad(b2, ((0, 0), (0, Np - f)))

    out = pl.pallas_call(
        _linear_kernel,
        out_shape=jax.ShapeDtypeStruct((Mp, Np), out_dtype),
        grid=(Mp // tm, Np // tn, Kp // tk),
        in_specs=[
            pl.BlockSpec((tm, tk), lambda i, j, k: (i, k)),
            pl.BlockSpec((tn, tk), lambda i, j, k: (j, k)),
            pl.BlockSpec((1, tn), lambda i, j, k: (0, j)),
        ],
        out_specs=pl.BlockSpec((tm, tn), lambda i, j, k: (i, j)),
        scratch_shapes=[pltpu.VMEM((tm, tn), jnp.float32)],
        compiler_params=pltpu.CompilerParams(
            dimension_semantics=("parallel", "parallel", "arbitrary")),
    )(x_flat, filt, b2)
    return out[:M, :f]


# ----------------------------------------------------------------------------
# Full ETHERLinear forward (Htype='ether', flip_side=False, dropout=0)
# ----------------------------------------------------------------------------
@functools.partial(jax.jit, static_argnames=("nb",))
def ether_linear_forward(x, weight, bias, ether_R, nb):
    # x: [batch, seq, d]; weight: [f, d]; bias: [f]; ether_R: [nb, d // nb]
    filt = ether_transform_weight(weight, ether_R, nb)
    lead = x.shape[:-1]
    d = x.shape[-1]
    y = pallas_linear(x.reshape(-1, d), filt, bias)
    return y.reshape(*lead, weight.shape[0])


# ----------------------------------------------------------------------------
# Pure-JAX reference for verification
# ----------------------------------------------------------------------------
def ether_linear_reference(x, weight, bias, ether_R, nb):
    m = ether_R.shape[-1]
    R = ether_R[:, None, :]                                           # (nb, 1, m)
    I = jnp.broadcast_to(jnp.eye(m, dtype=jnp.float32), (nb, m, m))
    num = jnp.einsum("rim,rin->rmn", R, R)                            # R^T R
    den = jnp.einsum("rim,rim->r", R, R)[:, None, None]               # R R^T
    H = I - 2.0 * num / den
    f, d = weight.shape
    filt = weight.reshape(nb, f, d // nb)
    filt = jnp.einsum("rfm,rmn->rfn", filt, H).reshape(f, d)
    return x @ filt.T + bias


if __name__ == "__main__":
    # Small config consistent with the module: nb must divide in_features.
    batch, seq = 2, 8
    in_features, out_features, nb = 32, 48, 4

    key = jax.random.PRNGKey(0)
    kx, kw, kb, kr = jax.random.split(key, 4)

    x = jax.random.normal(kx, (batch, seq, in_features), dtype=jnp.float32)
    # Deterministic synthetic parameter init (shapes from the module's __init__).
    bound = 1.0 / (in_features ** 0.5)
    weight = jax.random.uniform(kw, (out_features, in_features),
                                minval=-bound, maxval=bound, dtype=jnp.float32)
    bias = jax.random.uniform(kb, (out_features,),
                              minval=-bound, maxval=bound, dtype=jnp.float32)
    # ether_R: [nb, in_features // nb] (kaiming-uniform-like deterministic init)
    ether_R = jax.random.uniform(kr, (nb, in_features // nb),
                                 minval=-1.0, maxval=1.0, dtype=jnp.float32)

    out = ether_linear_forward(x, weight, bias, ether_R, nb)
    out = jax.block_until_ready(out)

    ref = ether_linear_reference(x, weight, bias, ether_R, nb)
    assert out.shape == (batch, seq, out_features)
    assert jnp.allclose(out, ref, atol=1e-4, rtol=1e-4), (
        f"max abs err {jnp.max(jnp.abs(out - ref))}"
    )
    print("KERNEL_OK")
</pallas_src>

<mosaic_0001>
module attributes {stable_mosaic.version = 11 : i64} {
  func.func @_ether_transform_kernel(%arg0: i32, %arg1: i32, %arg2: memref<1x1x8xf32, #tpu.memory_space<vmem>>, %arg3: memref<1x48x8xf32, #tpu.memory_space<vmem>>, %arg4: memref<1x48x8xf32, #tpu.memory_space<vmem>>) attributes {dimension_semantics = [#tpu.dimension_semantics<parallel>, #tpu.dimension_semantics<parallel>], iteration_bounds = array<i64: 4, 1>, scalar_prefetch = 0 : i64, scratch_operands = 0 : i64, tpu.core_type = #tpu.core_type<tc>, window_params = [{transform_indices = @transform_0, window_bounds = array<i64: 1, 1, 8>}, {transform_indices = @transform_1, window_bounds = array<i64: 1, 48, 8>}, {transform_indices = @transform_2, window_bounds = array<i64: 1, 48, 8>}]} {
    %c0 = arith.constant 0 : index
    %c0_0 = arith.constant 0 : index
    %c0_1 = arith.constant 0 : index
    %0 = vector.load %arg2[%c0, %c0_0, %c0_1] : memref<1x1x8xf32, #tpu.memory_space<vmem>>, vector<1x1x8xf32>
    %1 = vector.shape_cast %0 : vector<1x1x8xf32> to vector<1x8xf32>
    %c0_2 = arith.constant 0 : index
    %c0_3 = arith.constant 0 : index
    %c0_4 = arith.constant 0 : index
    %2 = vector.load %arg3[%c0_2, %c0_3, %c0_4] : memref<1x48x8xf32, #tpu.memory_space<vmem>>, vector<1x48x8xf32>
    %3 = vector.shape_cast %2 : vector<1x48x8xf32> to vector<48x8xf32>
    %4 = arith.mulf %1, %1 : vector<1x8xf32>
    %5 = vector.shape_cast %4 : vector<1x8xf32> to vector<1x1x8xf32>
    %cst = arith.constant dense<0.000000e+00> : vector<1xf32>
    %6 = vector.multi_reduction <add>, %5, %cst [1, 2] : vector<1x1x8xf32> to vector<1xf32>
    %7 = vector.shape_cast %6 : vector<1xf32> to vector<1x1x1xf32>
    %8 = vector.extract %7[0, 0, 0] : f32 from vector<1x1x1xf32>
    %9 = vector.broadcast %1 : vector<1x8xf32> to vector<48x8xf32>
    %10 = arith.mulf %3, %9 : vector<48x8xf32>
    %cst_5 = arith.constant dense<0.000000e+00> : vector<48xf32>
    %11 = vector.multi_reduction <add>, %10, %cst_5 [1] : vector<48x8xf32> to vector<48xf32>
    %12 = vector.shape_cast %11 : vector<48xf32> to vector<48x1xf32>
    %cst_6 = arith.constant 2.000000e+00 : f32
    %13 = arith.divf %cst_6, %8 : f32
    %14 = vector.broadcast %13 : f32 to vector<48x1xf32>
    %15 = arith.mulf %14, %12 : vector<48x1xf32>
    %16 = vector.broadcast %15 : vector<48x1xf32> to vector<48x8xf32>
    %17 = vector.broadcast %1 : vector<1x8xf32> to vector<48x8xf32>
    %18 = arith.mulf %16, %17 : vector<48x8xf32>
    %19 = arith.subf %3, %18 : vector<48x8xf32>
    %c0_7 = arith.constant 0 : index
    %c0_8 = arith.constant 0 : index
    %c0_9 = arith.constant 0 : index
    %20 = vector.load %arg4[%c0_7, %c0_8, %c0_9] : memref<1x48x8xf32, #tpu.memory_space<vmem>>, vector<1x48x8xf32>
    %21 = vector.shape_cast %20 : vector<1x48x8xf32> to vector<48x8xf32>
    %22 = vector.shape_cast %19 : vector<48x8xf32> to vector<1x48x8xf32>
    tpu.vector_store %arg4[%c0_7, %c0_8, %c0_9], %22 {strides = array<i32>} : memref<1x48x8xf32, #tpu.memory_space<vmem>>, vector<1x48x8xf32>,
    return
  }
  func.func @transform_0(%arg0: i32, %arg1: i32) -> (i32, i32, i32) {
    %c0_i32 = arith.constant 0 : i32
    %c0_i32_0 = arith.constant 0 : i32
    %c0_i32_1 = arith.constant 0 : i32
    return %arg0, %c0_i32, %c0_i32_0 : i32, i32, i32
  }
  func.func @transform_1(%arg0: i32, %arg1: i32) -> (i32, i32, i32) {
    %c0_i32 = arith.constant 0 : i32
    %c0_i32_0 = arith.constant 0 : i32
    return %arg0, %arg1, %c0_i32 : i32, i32, i32
  }
  func.func @transform_2(%arg0: i32, %arg1: i32) -> (i32, i32, i32) {
    %c0_i32 = arith.constant 0 : i32
    %c0_i32_0 = arith.constant 0 : i32
    return %arg0, %arg1, %c0_i32 : i32, i32, i32
  }
}

module attributes {stable_mosaic.version = 11 : i64} {
  func.func @_linear_kernel(%arg0: i32, %arg1: i32, %arg2: i32, %arg3: memref<16x128xf32, #tpu.memory_space<vmem>>, %arg4: memref<128x128xf32, #tpu.memory_space<vmem>>, %arg5: memref<1x128xf32, #tpu.memory_space<vmem>>, %arg6: memref<16x128xf32, #tpu.memory_space<vmem>>, %arg7: memref<16x128xf32, #tpu.memory_space<vmem>>) attributes {dimension_semantics = [#tpu.dimension_semantics<parallel>, #tpu.dimension_semantics<parallel>, #tpu.dimension_semantics<arbitrary>], iteration_bounds = array<i64: 1, 1, 1>, scalar_prefetch = 0 : i64, scratch_operands = 1 : i64, tpu.core_type = #tpu.core_type<tc>, window_params = [{transform_indices = @transform_0, window_bounds = array<i64: 16, 128>}, {transform_indices = @transform_1, window_bounds = array<i64: 128, 128>}, {transform_indices = @transform_2, window_bounds = array<i64: 1, 128>}, {transform_indices = @transform_3, window_bounds = array<i64: 16, 128>}]} {
    %c0_i32 = arith.constant 0 : i32
    %0 = arith.cmpi eq, %arg2, %c0_i32 : i32
    %1 = arith.extui %0 : i1 to i32
    %c0_i32_0 = arith.constant 0 : i32
    %2 = arith.cmpi ne, %1, %c0_i32_0 : i32
    scf.if %2 {
      %cst_10 = arith.constant 0.000000e+00 : f32
      %12 = vector.broadcast %cst_10 : f32 to vector<16x128xf32>
      %c0_11 = arith.constant 0 : index
      %c0_12 = arith.constant 0 : index
      %13 = vector.load %arg7[%c0_11, %c0_12] : memref<16x128xf32, #tpu.memory_space<vmem>>, vector<16x128xf32>
      tpu.vector_store %arg7[%c0_11, %c0_12], %12 {strides = array<i32>} : memref<16x128xf32, #tpu.memory_space<vmem>>, vector<16x128xf32>,
    } else {
    }
    %c0 = arith.constant 0 : index
    %c0_1 = arith.constant 0 : index
    %3 = vector.load %arg7[%c0, %c0_1] : memref<16x128xf32, #tpu.memory_space<vmem>>, vector<16x128xf32>
    %c0_2 = arith.constant 0 : index
    %c0_3 = arith.constant 0 : index
    %4 = vector.load %arg3[%c0_2, %c0_3] : memref<16x128xf32, #tpu.memory_space<vmem>>, vector<16x128xf32>
    %c0_4 = arith.constant 0 : index
    %c0_5 = arith.constant 0 : index
    %5 = vector.load %arg4[%c0_4, %c0_5] : memref<128x128xf32, #tpu.memory_space<vmem>>, vector<128x128xf32>
    %cst = arith.constant dense<0.000000e+00> : vector<16x128xf32>
    %6 = tpu.matmul %4, %5, %cst {dimension_numbers = #tpu.dot_dimension_numbers<[1], [1], [0], [0], [0, 0, 1, 0], [], []>} : vector<16x128xf32>, vector<128x128xf32>, vector<16x128xf32> -> vector<16x128xf32>
    %7 = arith.addf %3, %6 : vector<16x128xf32>
    %c0_6 = arith.constant 0 : index
    %c0_7 = arith.constant 0 : index
    %8 = vector.load %arg7[%c0_6, %c0_7] : memref<16x128xf32, #tpu.memory_space<vmem>>, vector<16x128xf32>
    tpu.vector_store %arg7[%c0_6, %c0_7], %7 {strides = array<i32>} : memref<16x128xf32, #tpu.memory_space<vmem>>, vector<16x128xf32>,
    %c0_i32_8 = arith.constant 0 : i32
    %9 = arith.cmpi eq, %arg2, %c0_i32_8 : i32
    %10 = arith.extui %9 : i1 to i32
    %c0_i32_9 = arith.constant 0 : i32
    %11 = arith.cmpi ne, %10, %c0_i32_9 : i32
    scf.if %11 {
      %c0_10 = arith.constant 0 : index
      %c0_11 = arith.constant 0 : index
      %12 = vector.load %arg7[%c0_10, %c0_11] : memref<16x128xf32, #tpu.memory_space<vmem>>, vector<16x128xf32>
      %c0_12 = arith.constant 0 : index
      %c0_13 = arith.constant 0 : index
      %13 = vector.load %arg5[%c0_12, %c0_13] : memref<1x128xf32, #tpu.memory_space<vmem>>, vector<1x128xf32>
      %14 = vector.broadcast %13 : vector<1x128xf32> to vector<16x128xf32>
      %15 = arith.addf %12, %14 : vector<16x128xf32>
      %c0_14 = arith.constant 0 : index
      %c0_15 = arith.constant 0 : index
      %16 = vector.load %arg6[%c0_14, %c0_15] : memref<16x128xf32, #tpu.memory_space<vmem>>, vector<16x128xf32>
      tpu.vector_store %arg6[%c0_14, %c0_15], %15 {strides = array<i32>} : memref<16x128xf32, #tpu.memory_space<vmem>>, vector<16x128xf32>,
    } else {
    }
    return
  }
  func.func @transform_0(%arg0: i32, %arg1: i32, %arg2: i32) -> (i32, i32) {
    %c0_i32 = arith.constant 0 : i32
    return %arg0, %arg2 : i32, i32
  }
  func.func @transform_1(%arg0: i32, %arg1: i32, %arg2: i32) -> (i32, i32) {
    %c0_i32 = arith.constant 0 : i32
    return %arg1, %arg2 : i32, i32
  }
  func.func @transform_2(%arg0: i32, %arg1: i32, %arg2: i32) -> (i32, i32) {
    %c0_i32 = arith.constant 0 : i32
    %c0_i32_0 = arith.constant 0 : i32
    return %c0_i32, %arg1 : i32, i32
  }
  func.func @transform_3(%arg0: i32, %arg1: i32, %arg2: i32) -> (i32, i32) {
    %c0_i32 = arith.constant 0 : i32
    return %arg0, %arg1 : i32, i32
  }
}

</mosaic_0001>

<bundles_post_ra>
// kernel: ether_linear_forward.2
= control target key start
LH: loop header
LB: loop body
LE: loop exit
PB: predicated region body
PF: predicated region fallthrough
CT: control target
= control target key end

     0   :  { %s451_s9 = smov 0   ;;  %s453_s10 = smov 0   ;;  %s527_s0 = inlined_call_operand.vmem [shape: f32[4,1,8], index: 0, kind: input, shape index: {}]   ;;  %s528_s1 = inlined_call_operand.vmem [shape: f32[4,48,8], index: 1, kind: input, shape index: {}]   ;;  %s529_s2 = inlined_call_operand.vmem [shape: f32[4,48,8], index: 2, kind: output, shape index: {}]  }
   0x1   :  { %s455_s11 = smov 0  }
   0x2 LB: > { %s24_s12 = sadd.s32 1, %s430_s10  ;;  %p376_p0 = scmp.ge.s32.totalorder %s434_s11, 1  ;;  %s434_s11 = sphi %s455_s11, %s12_s11   ;;  %s430_s10 = sphi %s453_s10, %s531_s10   ;;  %s426_s9 = sphi %s451_s9, %s530_s9  }
   0x3   : > { %p26_p1 = scmp.ge.s32.totalorder %s24_s12, 4  ;;  %p141_p2 = scmp.lt.s32.totalorder %s434_s11, 5 }
   0x5   : > { %s533_s12 = smov (%p26_p1, %s24_s12), 0  ;;  %p142_p3 = pnand %p376_p0, %p141_p2 }
   0x6   : > { %p174_p4 = scmp.lt.s32.totalorder (!%p142_p3), %s426_s9, 3 }
   0x7   : > { %145 = sbr.rel (%p142_p3) target bundleno = 295 (0x127), region = 28 }
   0xc   : > { %v217_v0 = vlaneseq  ;;  %s535_s9 = smov (!%p174_p4, %s426_s9), 3  ;;  %vm205_vm0 = vcmask 57344   ;;  %vm228_vm1 = vcmask 64512  }
   0xd   : > { %s176_s15 = scalar_lea.vmem %s527_s0, %s535_s9  ;;  %s381_s16 = smul.u32 48, %s535_s9 }
   0xe   : > { %v218_v1 = vshrl.u32 %v217_v0, 7  ;;  %v197_v3 = vld [vmem:[%s176_s15] sm:$0x1] }
   0xf   : > { %s185_s19 = scalar_lea.vmem %s528_s1, %s381_s16  ;;  %v204_v4 = vmul.f32 %v197_v3, %v197_v3  ;;  %s195_s25 = scalar_lea.vmem %s529_s2, %s381_s16 }
  0x10   : > { %v219_v2 = vsub.s32 0, %v218_v1  ;;  %v481_v6 = vld [vmem:[%s185_s19 + $0x8] sm:$0xff]  ;;  %v483_v7 = vld [vmem:[%s185_s19] sm:$0xff]  ;;  %v485_v8 = vld [vmem:[%s185_s19 + $0x10] sm:$0xff] }
  0x11   : > { %v206_v9 = vsel %vm205_vm0, %v204_v4, 0.0  ;;  %v490_v13 = vld [vmem:[%s185_s19 + $0x18] sm:$0xff]  ;;  %v492_v14 = vld [vmem:[%s185_s19 + $0x20] sm:$0xff]  ;;  %v203_v18 = vld [vmem:[%s185_s19 + $0x28] sm:$0xff] }
  0x12   : > { %v220_v5 = vrot.slane %v197_v3, %v219_v2  ;;  %207 = vadd.xlane.f32.xlu0 %v206_v9 }
  0x14   : > { %v223_v10 = vmul.f32 %v220_v5, %v481_v6  ;;  %v222_v11 = vmul.f32 %v220_v5, %v483_v7  ;;  %v224_v12 = vmul.f32 %v220_v5, %v485_v8  ;;  %v225_v17 = vmul.f32 %v220_v5, %v490_v13 }
  0x15   : > { %v226_v20 = vmul.f32 %v220_v5, %v492_v14  ;;  %v227_v22 = vmul.f32 %v220_v5, %v203_v18 }
  0x16   : > { %v232_v15 = vsel %vm228_vm1, %v223_v10, 0.0  ;;  %v229_v16 = vsel %vm228_vm1, %v222_v11, 0.0  ;;  %v235_v19 = vsel %vm228_vm1, %v224_v12, 0.0  ;;  %v238_v21 = vsel %vm228_vm1, %v225_v17, 0.0 }
  0x17   : > { %233 = vadd.xlane.f32.xlu1 %v232_v15  ;;  %230 = vadd.xlane.f32.xlu0 %v229_v16  ;;  %v241_v23 = vsel %vm228_vm1, %v226_v20, 0.0  ;;  %v244_v24 = vsel %vm228_vm1, %v227_v22, 0.0 }
  0x1b   : > { %236 = vadd.xlane.f32.xlu1 %v235_v19  ;;  %239 = vadd.xlane.f32.xlu0 %v238_v21 }
  0x1f   : > { %242 = vadd.xlane.f32.xlu1 %v241_v23  ;;  %245 = vadd.xlane.f32.xlu0 %v244_v24 }
  0x9b   : > { %v208_v25 = vpop.xlane.xlu0 %207 }
  0x9c   : > { %v209_v26 = vrot.slane %v208_v25, 4 }
  0x9e   : > { %v210_v27 = vadd.f32 %v209_v26, %v208_v25 }
  0xa0   : > { %v211_v28 = vrot.slane %v210_v27, 2  ;;  %v234_v34 = vpop.xlane.xlu1 %233  ;;  %v231_v35 = vpop.xlane.xlu0 %230 }
  0xa2   : > { %v212_v29 = vadd.f32 %v211_v28, %v210_v27 }
  0xa4   : > { %v213_v30 = vrot.slane %v212_v29, 1  ;;  %v237_v36 = vpop.xlane.xlu1 %236  ;;  %v240_v37 = vpop.xlane.xlu0 %239 }
  0xa6   : > { %v214_v31 = vadd.f32 %v213_v30, %v212_v29 }
  0xa8   : > { %382 = vpush %v214_v31  ;;  %v243_v38 = vpop.xlane.xlu1 %242  ;;  %v246_v39 = vpop.xlane.xlu0 %245 }
  0xd9   : > { %s383_s20 = spop %382 }
  0xda   : > { %v247_v32 = vstv %s383_s20 }
  0xdb   : > { %410 = vrcp.f32 %v247_v32 }
  0xe8   : > { %v411_v33 = vpop.eup %410 }
  0xe9   : > { %384 = vpush %v411_v33 }
 0x11a   : > { %s385_s21 = spop %384 }
 0x11b   : > { %s250_s22 = smul.f32 2.0, %s385_s21 }
 0x11d   : > { %v251_v40 = vstv %s250_s22 }
 0x11e   : > { %v252_v41 = vmul.f32 %v251_v40, %v231_v35  ;;  %v253_v42 = vmul.f32 %v251_v40, %v234_v34  ;;  %v254_v43 = vmul.f32 %v251_v40, %v237_v36  ;;  %v255_v44 = vmul.f32 %v251_v40, %v240_v37 }
 0x11f   : > { %v256_v45 = vmul.f32 %v251_v40, %v243_v38  ;;  %v257_v46 = vmul.f32 %v251_v40, %v246_v39 }
 0x120   : > { %v258_v47 = vmul.f32 %v252_v41, %v220_v5  ;;  %v259_v48 = vmul.f32 %v253_v42, %v220_v5  ;;  %v260_v49 = vmul.f32 %v254_v43, %v220_v5  ;;  %v261_v50 = vmul.f32 %v255_v44, %v220_v5 }
 0x121   : > { %v262_v51 = vmul.f32 %v256_v45, %v220_v5  ;;  %v263_v52 = vmul.f32 %v257_v46, %v220_v5 }
 0x122   : > { %v264_v53 = vsub.f32 %v483_v7, %v258_v47  ;;  %v265_v54 = vsub.f32 %v481_v6, %v259_v48  ;;  %v266_v55 = vsub.f32 %v485_v8, %v260_v49  ;;  %v267_v56 = vsub.f32 %v490_v13, %v261_v50 }
 0x123   : > { %v268_v57 = vsub.f32 %v492_v14, %v262_v51  ;;  %v269_v58 = vsub.f32 %v203_v18, %v263_v52 }
 0x124   : > { %270 = vst.msk [vmem:[%s195_s25] sm:$0xff] %vm228_vm1, %v264_v53  ;;  %271 = vst.msk [vmem:[%s195_s25 + $0x8] sm:$0xff] %vm228_vm1, %v265_v54 }
 0x125   : > { %272 = vst.msk [vmem:[%s195_s25 + $0x10] sm:$0xff] %vm228_vm1, %v266_v55  ;;  %273 = vst.msk [vmem:[%s195_s25 + $0x18] sm:$0xff] %vm228_vm1, %v267_v56 }
 0x126   : > { %274 = vst.msk [vmem:[%s195_s25 + $0x20] sm:$0xff] %vm228_vm1, %v268_v57  ;;  %275 = vst.msk [vmem:[%s195_s25 + $0x28] sm:$0xff] %vm228_vm1, %v269_v58 }
 0x127 PF: > { %s12_s11 = sadd.s32 1, %s434_s11   ;;  %s530_s9 = smov %s430_s10 }
 0x128   : > { %p9_p5 = scmp.ge.s32.totalorder %s12_s11, 6   ;;  %s531_s10 = smov %s533_s12 }
 0x12a   :  { %11 = sbr.rel (!%p9_p5) target bundleno = 2 (0x2), region = 61 }

// kernel: ether_linear_forward.3
= control target key start
LH: loop header
LB: loop body
LE: loop exit
PB: predicated region body
PF: predicated region fallthrough
CT: control target
= control target key end

     0   :  { %s276_s1 = inlined_call_operand.vmem [shape: f32[128,128], index: 1, kind: input, shape index: {}]   ;;  %s277_s0 = inlined_call_operand.vmem [shape: f32[16,128], index: 0, kind: input, shape index: {}]   ;;  %s278_s2 = inlined_call_operand.vmem [shape: f32[1,128], index: 2, kind: input, shape index: {}]   ;;  %s279_s3 = inlined_call_operand.vmem [shape: f32[16,128], index: 3, kind: output, shape index: {}]  }
   0x1   :  { %v39_v0 = vld [vmem:[%s276_s1 + $0x78] sm:$0xff]  ;;  %v38_v1 = vld [vmem:[%s276_s1 + $0x70] sm:$0xff]  ;;  %v37_v2 = vld [vmem:[%s276_s1 + $0x68] sm:$0xff] }
   0x2   :  { %158 = vmatprep.subr.mxu0 %v39_v0  ;;  %v22_v3 = vld [vmem:[%s277_s0] sm:$0xff]  ;;  %v35_v5 = vld [vmem:[%s276_s1 + $0x58] sm:$0xff]  ;;  %v34_v6 = vld [vmem:[%s276_s1 + $0x50] sm:$0xff] }
   0x3   :  { %159 = vmatpush3.xpose.msra.mxu0 %v39_v0  ;;  %190 = vmatprep.mubr.f32.mxu0 %v22_v3  ;;  %v36_v4 = vld [vmem:[%s276_s1 + $0x60] sm:$0xff]  ;;  %v33_v7 = vld [vmem:[%s276_s1 + $0x48] sm:$0xff]  ;;  %v31_v9 = vld [vmem:[%s276_s1 + $0x38] sm:$0xff] }
   0x4   :  { %160 = vmatprep.subr.mxu0 %v38_v1  ;;  %v32_v8 = vld [vmem:[%s276_s1 + $0x40] sm:$0xff]  ;;  %v30_v10 = vld [vmem:[%s276_s1 + $0x30] sm:$0xff]  ;;  %v29_v11 = vld [vmem:[%s276_s1 + $0x28] sm:$0xff] }
   0x5   :  { %v28_v12 = vld [vmem:[%s276_s1 + $0x20] sm:$0xff]  ;;  %v27_v13 = vld [vmem:[%s276_s1 + $0x18] sm:$0xff]  ;;  %v26_v14 = vld [vmem:[%s276_s1 + $0x10] sm:$0xff] }
   0x6   :  { %v25_v15 = vld [vmem:[%s276_s1 + $0x8] sm:$0xff]  ;;  %v24_v16 = vld [vmem:[%s276_s1] sm:$0xff] }
   0x7   :  { %161 = vmatpush3.xpose.msra.mxu0 %v38_v1  ;;  %v23_v17 = vld [vmem:[%s277_s0 + $0x8] sm:$0xff]  ;;  %v139_v18 = vld [vmem:[%s278_s2] ss:$0 sm:$0xff] }
   0x8   :  { %162 = vmatprep.subr.mxu0 %v37_v2 }
   0xb   :  { %163 = vmatpush3.xpose.msra.mxu0 %v37_v2 }
   0xc   :  { %164 = vmatprep.subr.mxu0 %v36_v4 }
   0xf   :  { %165 = vmatpush3.xpose.msra.mxu0 %v36_v4 }
  0x10   :  { %166 = vmatprep.subr.mxu0 %v35_v5 }
  0x13   :  { %167 = vmatpush3.xpose.msra.mxu0 %v35_v5 }
  0x14   :  { %168 = vmatprep.subr.mxu0 %v34_v6 }
  0x17   :  { %169 = vmatpush3.xpose.msra.mxu0 %v34_v6 }
  0x18   :  { %170 = vmatprep.subr.mxu0 %v33_v7 }
  0x1b   :  { %171 = vmatpush3.xpose.msra.mxu0 %v33_v7 }
  0x1c   :  { %172 = vmatprep.subr.mxu0 %v32_v8 }
  0x1f   :  { %173 = vmatpush3.xpose.msra.mxu0 %v32_v8 }
  0x20   :  { %174 = vmatprep.subr.mxu0 %v31_v9 }
  0x23   :  { %175 = vmatpush3.xpose.msra.mxu0 %v31_v9 }
  0x24   :  { %176 = vmatprep.subr.mxu0 %v30_v10 }
  0x27   :  { %177 = vmatpush3.xpose.msra.mxu0 %v30_v10 }
  0x28   :  { %178 = vmatprep.subr.mxu0 %v29_v11 }
  0x2b   :  { %179 = vmatpush3.xpose.msra.mxu0 %v29_v11 }
  0x2c   :  { %180 = vmatprep.subr.mxu0 %v28_v12 }
  0x2f   :  { %181 = vmatpush3.xpose.msra.mxu0 %v28_v12 }
  0x30   :  { %182 = vmatprep.subr.mxu0 %v27_v13 }
  0x33   :  { %183 = vmatpush3.xpose.msra.mxu0 %v27_v13 }
  0x34   :  { %184 = vmatprep.subr.mxu0 %v26_v14 }
  0x37   :  { %185 = vmatpush3.xpose.msra.mxu0 %v26_v14 }
  0x38   :  { %186 = vmatprep.subr.mxu0 %v25_v15 }
  0x3b   :  { %187 = vmatpush3.xpose.msra.mxu0 %v25_v15 }
  0x3c   :  { %188 = vmatprep.subr.mxu0 %v24_v16 }
  0x3f   :  { %189 = vmatpush3.xpose.msra.mxu0 %v24_v16 }
  0x42   :  { %191 = vmatmul.mubr.f32.vlgmr.msra.gmra.mxu0 %v23_v17 }
 0x102   :  { %v192_v19 = vpop.f32.mrf.mxu0 }
 0x103   :  { %v132_v20 = vadd.f32 %v192_v19, %v139_v18 }
 0x104   :  { %v106_v21 = vpop.f32.mrf.mxu0 }
 0x105   :  { %134 = vst [vmem:[%s279_s3 + $0x8] sm:$0xff] %v132_v20  ;;  %v131_v22 = vadd.f32 %v139_v18, %v106_v21 }
 0x107   :  { %133 = vst [vmem:[%s279_s3] sm:$0xff] %v131_v22 }

</bundles_post_ra>
